<compile_context>
chip_gen: v6e
topology: v6e:2x2x1
jax: 0.10.0
libtpu: 0.0.40
codegen_flags: <defaults>
</compile_context>

<pallas_src>
import functools

import jax
import jax.numpy as jnp
from jax import lax
from jax.experimental import pallas as pl
from jax.experimental.pallas import tpu as pltpu


def _round_up(x, m):
    return ((x + m - 1) // m) * m


def _pick_block_batch(B, per_sentence_bytes, budget_bytes=12 << 20):
    """Largest divisor of B whose double-buffered I/O fits the budget, keeping grid >= 2."""
    best = 1
    for bt in range(1, B + 1):
        if B % bt != 0:
            continue
        if 2 * bt * per_sentence_bytes > budget_bytes:
            continue
        if B >= 2 and B // bt < 2:          # keep >= 2 grid steps for dual-TC (v7x) chips
            continue
        best = bt
    return best


# ----------------------------------------------------------------------------
# Fused kernel: MLP heads + arc biaffine (+mask fill) + rel biaffine, Bt sentences / grid step
# ----------------------------------------------------------------------------
def _fused_biaffine_kernel(lens_ref, x_ref, w1h_ref, b1h_ref, w1d_ref, b1d_ref,
                           w2_ref, b2_ref, s_arc_ref, s_rel_ref, *,
                           bt, n_arc, n_rel, n_rels, l_row, l_col):
    nb = pl.program_id(0)
    # (1, Lp_col) lane iota for the masked_fill -- no full (Lp,Lp) iota tile
    col = lax.broadcasted_iota(jnp.int32, (1, l_col), 1)
    dn = (((1,), (1,)), ((), ()))                                    # contract last dims; no .T

    for s in range(bt):                                              # static unrolled sentence loop
        n_valid = lens_ref[nb * bt + s]                              # valid length (SMEM scalar)
        x = x_ref[s]                                                 # [Lp_col, D] bf16

        # stage-0a: head-side MLP on all Lp_col rows (cols: arc_h | rel_h)
        hh = jnp.dot(x, w1h_ref[...], preferred_element_type=jnp.float32) + b1h_ref[...]
        hh = jnp.where(hh >= 0.0, hh, 0.1 * hh).astype(jnp.bfloat16)  # LeakyReLU(0.1)
        arc_h = hh[:, :n_arc]                                         # [Lp_col, n_arc]
        rel_h = hh[:, n_arc:]                                         # [Lp_col, n_rel]

        # stage-0b: dependent-side MLP on only Lp_row rows (cols: arc_d | rel_d)
        hd = jnp.dot(x[:l_row, :], w1d_ref[...], preferred_element_type=jnp.float32) + b1d_ref[...]
        hd = jnp.where(hd >= 0.0, hd, 0.1 * hd).astype(jnp.bfloat16)  # [Lp_row, n_arc+n_rel]

        # stage-1: both biaffine "dep @ W" products in ONE matmul, biaffine bias rows folded into b2
        # p columns: [t_arc (n_arc) | T1 all rels (R*n_rel) | c all rels (R)]
        p = jnp.dot(hd, w2_ref[...], preferred_element_type=jnp.float32) + b2_ref[...]
        t_arc = p[:, :n_arc].astype(jnp.bfloat16)
        t1 = p[:, n_arc:n_arc + n_rels * n_rel].astype(jnp.bfloat16)  # single bf16 cast for all r
        c = p[:, n_arc + n_rels * n_rel:]                              # [Lp_row, R] f32

        # arc biaffine + masked_fill (padded lanes get the fill for free)
        s_arc = lax.dot_general(t_arc, arc_h, dn, preferred_element_type=jnp.float32)
        s_arc_ref[s] = jnp.where(col < n_valid, s_arc, -100000.0).astype(s_arc_ref.dtype)

        # rel biaffine, all n_rels handled in this step (shared rel_h RHS)
        for r in range(n_rels):
            t1_r = t1[:, r * n_rel:(r + 1) * n_rel]
            s_r = lax.dot_general(t1_r, rel_h, dn, preferred_element_type=jnp.float32)
            s_rel_ref[s, r] = (s_r + c[:, r:r + 1]).astype(s_rel_ref.dtype)


def biaffine_scores(x, lens, prep, n_arc, n_rel, n_rels):
    """Returns padded s_arc [B, Lr, Lc] (masked-filled) and s_rel [B, R, Lr, Lc], both bf16."""
    B, L, D = x.shape
    R = n_rels
    Lr = _round_up(max(L, 16), 16)                                   # dependent rows (bf16 sublane)
    Lc = _round_up(max(L, 128), 128)                                 # head cols (lane-dense)
    nh = n_arc + n_rel
    n2 = n_arc + R * n_rel + R

    # pad sequence dim; padded rows are masked out of the loss, padded cols get the -1e5 fill
    x_p = jnp.zeros((B, Lc, D), jnp.bfloat16).at[:, :L, :].set(x.astype(jnp.bfloat16))

    per_sent = (Lc * D + Lr * Lc + R * Lr * Lc) * 2                  # bf16 I/O bytes per sentence
    Bt = _pick_block_batch(B, per_sent)
    weight_bytes = 2 * (D * nh + nh) * 4 + (nh * n2 + n2) * 4
    vmem_limit = int(min(48 << 20, max(32 << 20, 3 * Bt * per_sent + 2 * weight_bytes + (4 << 20))))

    kernel = functools.partial(_fused_biaffine_kernel, bt=Bt, n_arc=n_arc, n_rel=n_rel,
                               n_rels=R, l_row=Lr, l_col=Lc)

    grid_spec = pltpu.PrefetchScalarGridSpec(
        num_scalar_prefetch=1,
        grid=(B // Bt,),
        in_specs=[
            pl.BlockSpec((Bt, Lc, D), lambda nb, lens: (nb, 0, 0)),
            pl.BlockSpec((D, nh), lambda nb, lens: (0, 0)),
            pl.BlockSpec((1, nh), lambda nb, lens: (0, 0)),
            pl.BlockSpec((D, nh), lambda nb, lens: (0, 0)),
            pl.BlockSpec((1, nh), lambda nb, lens: (0, 0)),
            pl.BlockSpec((nh, n2), lambda nb, lens: (0, 0)),
            pl.BlockSpec((1, n2), lambda nb, lens: (0, 0)),
        ],
        out_specs=[
            pl.BlockSpec((Bt, Lr, Lc), lambda nb, lens: (nb, 0, 0)),
            pl.BlockSpec((Bt, R, Lr, Lc), lambda nb, lens: (nb, 0, 0, 0)),
        ],
    )

    s_arc_p, s_rel_p = pl.pallas_call(
        kernel,
        grid_spec=grid_spec,
        out_shape=(jax.ShapeDtypeStruct((B, Lr, Lc), jnp.bfloat16),
                   jax.ShapeDtypeStruct((B, R, Lr, Lc), jnp.bfloat16)),
        compiler_params=pltpu.CompilerParams(dimension_semantics=("parallel",),
                                             vmem_limit_bytes=vmem_limit),
    )(lens.astype(jnp.int32), x_p,
      prep["w1h"], prep["b1h"], prep["w1d"], prep["b1d"], prep["w2"], prep["b2"])

    return s_arc_p, s_rel_p


# ----------------------------------------------------------------------------
# Parameters (deterministic, synthetic) -- shapes per BiaffineAE.__init__
# MLP weight columns are concatenated in the order [arc_h | arc_d | rel_d | rel_h]
# ----------------------------------------------------------------------------
def init_params(key, d_in, n_arc, n_rel, n_rels, kcluster):
    k = jax.random.split(key, 4)
    d_out = 2 * n_arc + 2 * n_rel
    return {
        "w_mlp": 0.1 * jax.random.normal(k[0], (d_in, d_out), jnp.float32),
        "b_mlp": 0.1 * jax.random.normal(k[1], (1, d_out), jnp.float32),
        # Biaffine(n_in=n_arc, bias_x=True, bias_y=False): weight (n_arc+1, n_arc)
        "w_arc": 0.1 * jax.random.normal(k[2], (n_arc + 1, n_arc), jnp.float32),
        # Biaffine(n_in=n_rel, n_out=n_rels, bias_x=True, bias_y=True)
        "w_rel": 0.1 * jax.random.normal(k[3], (n_rels, n_rel + 1, n_rel + 1), jnp.float32),
        # self.multinomial = nn.Parameter(torch.ones(kcluster, kcluster))
        "multinomial": jnp.ones((kcluster, kcluster), jnp.float32),
    }


def prepare_params(params, n_arc, n_rel):
    """One-time packing of the fused kernel operands (run OUTSIDE the training step)."""
    w_mlp, b_mlp = params["w_mlp"], params["b_mlp"]
    w_arc, w_rel = params["w_arc"], params["w_rel"]
    R = w_rel.shape[0]

    i_ah = slice(0, n_arc)
    i_ad = slice(n_arc, 2 * n_arc)
    i_rd = slice(2 * n_arc, 2 * n_arc + n_rel)
    i_rh = slice(2 * n_arc + n_rel, 2 * n_arc + 2 * n_rel)

    w1h = jnp.concatenate([w_mlp[:, i_ah], w_mlp[:, i_rh]], axis=1)   # head-side  [arc_h | rel_h]
    b1h = jnp.concatenate([b_mlp[:, i_ah], b_mlp[:, i_rh]], axis=1)
    w1d = jnp.concatenate([w_mlp[:, i_ad], w_mlp[:, i_rd]], axis=1)   # dep-side   [arc_d | rel_d]
    b1d = jnp.concatenate([b_mlp[:, i_ad], b_mlp[:, i_rd]], axis=1)

    # Fused stage-1: rows = [arc_d | rel_d], cols = [t_arc | T1 (R*n_rel) | c (R)].
    # Biaffine bias_x rows folded into b2; bias_y columns folded into the `c` columns of w2.
    n2 = n_arc + R * n_rel + R
    w_rel_dd = jnp.transpose(w_rel[:, :n_rel, :n_rel], (1, 0, 2)).reshape(n_rel, R * n_rel)
    w_rel_bd = w_rel[:, n_rel, :n_rel].reshape(R * n_rel)             # bias_x row, all r
    w_rel_db = jnp.transpose(w_rel[:, :n_rel, n_rel], (1, 0))         # [n_rel, R] bias_y col
    w_rel_bb = w_rel[:, n_rel, n_rel]                                 # [R]

    w2 = jnp.zeros((n_arc + n_rel, n2), jnp.float32)
    w2 = w2.at[:n_arc, :n_arc].set(w_arc[:n_arc, :])                  # arc stage-1
    w2 = w2.at[n_arc:, n_arc:n_arc + R * n_rel].set(w_rel_dd)         # rel stage-1 (all r)
    w2 = w2.at[n_arc:, n_arc + R * n_rel:].set(w_rel_db)              # rel bias_y column

    b2 = jnp.zeros((1, n2), jnp.float32)
    b2 = b2.at[0, :n_arc].set(w_arc[n_arc, :])                        # arc bias_x row
    b2 = b2.at[0, n_arc:n_arc + R * n_rel].set(w_rel_bd)              # rel bias_x rows
    b2 = b2.at[0, n_arc + R * n_rel:].set(w_rel_bb)                   # rel bias_x*bias_y

    return {
        "w1h": w1h.astype(jnp.bfloat16), "b1h": b1h.astype(jnp.float32),
        "w1d": w1d.astype(jnp.bfloat16), "b1d": b1d.astype(jnp.float32),
        "w2": w2.astype(jnp.bfloat16), "b2": b2.astype(jnp.float32),
        "multinomial": params["multinomial"].astype(jnp.float32),
    }


# ----------------------------------------------------------------------------
# Full forward (real_forward from LSTM output onwards + loss of BiaffineAE.forward)
# Loss math runs directly on the padded kernel outputs (mask handles padding).
# ----------------------------------------------------------------------------
def biaffine_ae_forward(prep, x, lens, cluster_labels, gold_arcs, gold_rels,
                        n_arc, n_rel, n_rels):
    B, L, _ = x.shape
    s_arc_p, s_rel_p = biaffine_scores(x, lens, prep, n_arc, n_rel, n_rels)
    Lr, Lc = s_arc_p.shape[1], s_arc_p.shape[2]

    tok_r = jnp.arange(Lr)
    tok_c = jnp.arange(Lc)
    mask_r = (tok_r[None, :] < lens[:, None]) & (tok_r[None, :] > 0)   # batch_mask over row dim
    mask_c = (tok_c[None, :] < lens[:, None]) & (tok_c[None, :] > 0)   # batch_mask over col dim
    mask_r_f = mask_r.astype(jnp.float32)
    mask_c_f = mask_c.astype(jnp.float32)
    total = jnp.sum(mask_r_f)

    def pad_to(a, n):
        return jnp.pad(a, ((0, 0), (0, n - a.shape[1])))
    labels_r, labels_c = pad_to(cluster_labels, Lr), pad_to(cluster_labels, Lc)
    gold_c, gold_r = pad_to(gold_arcs, Lc), pad_to(gold_arcs, Lr)
    rels_r = pad_to(gold_rels, Lr)

    arcs_prob = jax.nn.log_softmax(s_arc_p.astype(jnp.float32), axis=2)
    multinomial_prob = jax.nn.log_softmax(prep["multinomial"], axis=-1)
    recon = multinomial_prob[labels_r[:, :, None], labels_c[:, None, :]]
    all_arcs = recon + arcs_prob                                       # [B, Lr, Lc]

    # arcs CE exactly as the reference: permute(0,2,1) then CE over the row dim for each (b, token).
    logits = jnp.transpose(all_arcs, (0, 2, 1))                        # [B, Lc, Lr]
    logits = jnp.where(tok_r[None, None, :] < L, logits, -1e9)         # padded rows are not classes
    ce_arc = (jax.nn.logsumexp(logits, axis=-1)
              - jnp.take_along_axis(logits, gold_c[:, :, None], axis=-1)[..., 0])
    arcs_loss = jnp.sum(ce_arc * mask_c_f)

    # rel CE at gold-head positions, gathered straight from [B, R, Lr, Lc] (no full permute)
    rel_at_gold = jnp.take_along_axis(s_rel_p.astype(jnp.float32),
                                      gold_r[:, None, :, None], axis=3)[..., 0]   # [B, R, Lr]
    rel_at_gold = jnp.transpose(rel_at_gold, (0, 2, 1))                            # [B, Lr, R]
    ce_rel = (jax.nn.logsumexp(rel_at_gold, axis=-1)
              - jnp.take_along_axis(rel_at_gold, rels_r[..., None], axis=-1)[..., 0])
    rel_loss = jnp.sum(ce_rel * mask_r_f)

    loss = arcs_loss + rel_loss / total
    return loss, s_arc_p, s_rel_p, mask_r[:, :L]


# ----------------------------------------------------------------------------
# Plain-JAX f32 reference of real_forward's score computation (for a spot check)
# ----------------------------------------------------------------------------
def _reference_scores(x, lens, params, n_arc, n_rel):
    h = jnp.einsum('bld,dh->blh', x, params["w_mlp"]) + params["b_mlp"][0]
    h = jnp.where(h >= 0.0, h, 0.1 * h)
    arc_h = h[..., :n_arc]
    arc_d = h[..., n_arc:2 * n_arc]
    rel_d = h[..., 2 * n_arc:2 * n_arc + n_rel]
    rel_h = h[..., 2 * n_arc + n_rel:]
    ones = jnp.ones(h.shape[:2] + (1,), h.dtype)
    s_arc = jnp.einsum('bxi,ij,byj->bxy',
                       jnp.concatenate([arc_d, ones], -1), params["w_arc"], arc_h)
    L = x.shape[1]
    mask = jnp.arange(L)[None, :] < lens[:, None]
    s_arc = jnp.where(mask[:, None, :], s_arc, -100000.0)
    s_rel = jnp.einsum('bxi,rij,byj->brxy',
                       jnp.concatenate([rel_d, ones], -1), params["w_rel"],
                       jnp.concatenate([rel_h, ones], -1))
    return s_arc, s_rel


if __name__ == "__main__":
    # small config consistent with the module
    B, L = 2, 8
    n_lstm_hidden = 16
    d_in = 2 * n_lstm_hidden               # BiLSTM output feature size
    n_arc, n_rel = 32, 16
    n_rels, kcluster = 4, 3

    key = jax.random.PRNGKey(0)
    kx, kp, kl, ka, kr = jax.random.split(key, 5)

    x = jax.random.normal(kx, (B, L, d_in), dtype=jnp.float32)        # "LSTM output"
    params = init_params(kp, d_in, n_arc, n_rel, n_rels, kcluster)
    prep = prepare_params(params, n_arc, n_rel)                       # one-time packing
    lens = jnp.array([L, L - 2], dtype=jnp.int32)                     # per-sentence lengths
    cluster_labels = jax.random.randint(kl, (B, L), 0, kcluster)      # kmeans_labels (padded)
    gold_arcs = jax.random.randint(ka, (B, L), 0, L)                  # sent.heads (padded)
    gold_rels = jax.random.randint(kr, (B, L), 0, n_rels)             # sent.rels  (padded)

    fwd = jax.jit(biaffine_ae_forward, static_argnums=(6, 7, 8))
    loss, s_arc_p, s_rel_p, batch_mask = fwd(prep, x, lens, cluster_labels,
                                             gold_arcs, gold_rels, n_arc, n_rel, n_rels)
    jax.block_until_ready((loss, s_arc_p, s_rel_p, batch_mask))

    # decode-facing (sliced) views + sanity checks
    s_arc = s_arc_p[:, :L, :L].astype(jnp.float32)
    s_rel = s_rel_p[:, :, :L, :L].astype(jnp.float32)
    assert s_arc.shape == (B, L, L) and s_rel.shape == (B, n_rels, L, L)
    assert bool(jnp.isfinite(loss))

    # spot check against the plain f32 reference (bf16 MXU path -> loose tolerance)
    s_arc_ref, s_rel_ref = _reference_scores(x, lens, params, n_arc, n_rel)
    valid_col = (jnp.arange(L)[None, :] < lens[:, None])[:, None, :]
    err_arc = float(jnp.max(jnp.abs(jnp.where(valid_col, s_arc - s_arc_ref, 0.0))))
    err_rel = float(jnp.max(jnp.abs(s_rel - s_rel_ref)))
    assert err_arc < 0.15 and err_rel < 0.15, (err_arc, err_rel)

    print("KERNEL_OK")
</pallas_src>

<mosaic_0001>
module attributes {stable_mosaic.version = 11 : i64} {
  func.func @_fused_biaffine_kernel(%arg0: i32, %arg1: memref<2xi32, #tpu.memory_space<smem>>, %arg2: memref<1x128x32xbf16, #tpu.memory_space<vmem>>, %arg3: memref<32x48xbf16, #tpu.memory_space<vmem>>, %arg4: memref<1x48xf32, #tpu.memory_space<vmem>>, %arg5: memref<32x48xbf16, #tpu.memory_space<vmem>>, %arg6: memref<1x48xf32, #tpu.memory_space<vmem>>, %arg7: memref<48x100xbf16, #tpu.memory_space<vmem>>, %arg8: memref<1x100xf32, #tpu.memory_space<vmem>>, %arg9: memref<1x16x128xbf16, #tpu.memory_space<vmem>>, %arg10: memref<1x4x16x128xbf16, #tpu.memory_space<vmem>>) attributes {dimension_semantics = [#tpu.dimension_semantics<parallel>], iteration_bounds = array<i64: 2>, scalar_prefetch = 1 : i64, scratch_operands = 0 : i64, tpu.core_type = #tpu.core_type<tc>, window_params = [{transform_indices = @transform_0, window_bounds = array<i64: 1, 128, 32>}, {pipeline_mode = #tpu.pipeline_mode<synchronous>, transform_indices = @transform_1, window_bounds = array<i64: 32, 48>}, {pipeline_mode = #tpu.pipeline_mode<synchronous>, transform_indices = @transform_2, window_bounds = array<i64: 1, 48>}, {pipeline_mode = #tpu.pipeline_mode<synchronous>, transform_indices = @transform_3, window_bounds = array<i64: 32, 48>}, {pipeline_mode = #tpu.pipeline_mode<synchronous>, transform_indices = @transform_4, window_bounds = array<i64: 1, 48>}, {pipeline_mode = #tpu.pipeline_mode<synchronous>, transform_indices = @transform_5, window_bounds = array<i64: 48, 100>}, {pipeline_mode = #tpu.pipeline_mode<synchronous>, transform_indices = @transform_6, window_bounds = array<i64: 1, 100>}, {transform_indices = @transform_7, window_bounds = array<i64: 1, 16, 128>}, {transform_indices = @transform_8, window_bounds = array<i64: 1, 4, 16, 128>}]} {
    %0 = tpu.iota {dimensions = array<i32: 1>} : vector<1x128xi32>
    %c1_i32 = arith.constant 1 : i32
    %1 = arith.muli %arg0, %c1_i32 : i32
    %c0_i32 = arith.constant 0 : i32
    %2 = arith.addi %1, %c0_i32 : i32
    %3 = arith.index_cast %2 : i32 to index
    %4 = memref.load %arg1[%3] : memref<2xi32, #tpu.memory_space<smem>>
    %c0 = arith.constant 0 : index
    %c0_0 = arith.constant 0 : index
    %c0_1 = arith.constant 0 : index
    %5 = vector.load %arg2[%c0, %c0_0, %c0_1] : memref<1x128x32xbf16, #tpu.memory_space<vmem>>, vector<1x128x32xbf16>
    %6 = vector.shape_cast %5 : vector<1x128x32xbf16> to vector<128x32xbf16>
    %c0_2 = arith.constant 0 : index
    %c0_3 = arith.constant 0 : index
    %7 = vector.load %arg3[%c0_2, %c0_3] : memref<32x48xbf16, #tpu.memory_space<vmem>>, vector<32x48xbf16>
    %cst = arith.constant dense<0.000000e+00> : vector<128x48xf32>
    %8 = tpu.matmul %6, %7, %cst {dimension_numbers = #tpu.dot_dimension_numbers<[1], [0], [0], [1], [0, 0, 1, 1], [], []>} : vector<128x32xbf16>, vector<32x48xbf16>, vector<128x48xf32> -> vector<128x48xf32>
    %c0_4 = arith.constant 0 : index
    %c0_5 = arith.constant 0 : index
    %9 = vector.load %arg4[%c0_4, %c0_5] : memref<1x48xf32, #tpu.memory_space<vmem>>, vector<1x48xf32>
    %10 = vector.broadcast %9 : vector<1x48xf32> to vector<128x48xf32>
    %11 = arith.addf %8, %10 : vector<128x48xf32>
    %cst_6 = arith.constant 0.000000e+00 : f32
    %12 = vector.broadcast %cst_6 : f32 to vector<128x48xf32>
    %13 = arith.cmpf oge, %11, %12 : vector<128x48xf32>
    %cst_7 = arith.constant 1.000000e-01 : f32
    %14 = vector.broadcast %cst_7 : f32 to vector<128x48xf32>
    %15 = arith.mulf %14, %11 : vector<128x48xf32>
    %16 = arith.select %13, %11, %15 : vector<128x48xi1>, vector<128x48xf32>
    %17 = arith.truncf %16 : vector<128x48xf32> to vector<128x48xbf16>
    %18 = vector.extract_strided_slice %17 {offsets = [0, 0], sizes = [128, 32], strides = [1, 1]} : vector<128x48xbf16> to vector<128x32xbf16>
    %19 = vector.extract_strided_slice %17 {offsets = [0, 32], sizes = [128, 16], strides = [1, 1]} : vector<128x48xbf16> to vector<128x16xbf16>
    %20 = vector.extract_strided_slice %6 {offsets = [0, 0], sizes = [16, 32], strides = [1, 1]} : vector<128x32xbf16> to vector<16x32xbf16>
    %c0_8 = arith.constant 0 : index
    %c0_9 = arith.constant 0 : index
    %21 = vector.load %arg5[%c0_8, %c0_9] : memref<32x48xbf16, #tpu.memory_space<vmem>>, vector<32x48xbf16>
    %cst_10 = arith.constant dense<0.000000e+00> : vector<16x48xf32>
    %22 = tpu.matmul %20, %21, %cst_10 {dimension_numbers = #tpu.dot_dimension_numbers<[1], [0], [0], [1], [0, 0, 1, 1], [], []>} : vector<16x32xbf16>, vector<32x48xbf16>, vector<16x48xf32> -> vector<16x48xf32>
    %c0_11 = arith.constant 0 : index
    %c0_12 = arith.constant 0 : index
    %23 = vector.load %arg6[%c0_11, %c0_12] : memref<1x48xf32, #tpu.memory_space<vmem>>, vector<1x48xf32>
    %24 = vector.broadcast %23 : vector<1x48xf32> to vector<16x48xf32>
    %25 = arith.addf %22, %24 : vector<16x48xf32>
    %cst_13 = arith.constant 0.000000e+00 : f32
    %26 = vector.broadcast %cst_13 : f32 to vector<16x48xf32>
    %27 = arith.cmpf oge, %25, %26 : vector<16x48xf32>
    %cst_14 = arith.constant 1.000000e-01 : f32
    %28 = vector.broadcast %cst_14 : f32 to vector<16x48xf32>
    %29 = arith.mulf %28, %25 : vector<16x48xf32>
    %30 = arith.select %27, %25, %29 : vector<16x48xi1>, vector<16x48xf32>
    %31 = arith.truncf %30 : vector<16x48xf32> to vector<16x48xbf16>
    %c0_15 = arith.constant 0 : index
    %c0_16 = arith.constant 0 : index
    %32 = vector.load %arg7[%c0_15, %c0_16] : memref<48x100xbf16, #tpu.memory_space<vmem>>, vector<48x100xbf16>
    %cst_17 = arith.constant dense<0.000000e+00> : vector<16x100xf32>
    %33 = tpu.matmul %31, %32, %cst_17 {dimension_numbers = #tpu.dot_dimension_numbers<[1], [0], [0], [1], [0, 0, 1, 1], [], []>} : vector<16x48xbf16>, vector<48x100xbf16>, vector<16x100xf32> -> vector<16x100xf32>
    %c0_18 = arith.constant 0 : index
    %c0_19 = arith.constant 0 : index
    %34 = vector.load %arg8[%c0_18, %c0_19] : memref<1x100xf32, #tpu.memory_space<vmem>>, vector<1x100xf32>
    %35 = vector.broadcast %34 : vector<1x100xf32> to vector<16x100xf32>
    %36 = arith.addf %33, %35 : vector<16x100xf32>
    %37 = vector.extract_strided_slice %36 {offsets = [0, 0], sizes = [16, 32], strides = [1, 1]} : vector<16x100xf32> to vector<16x32xf32>
    %38 = arith.truncf %37 : vector<16x32xf32> to vector<16x32xbf16>
    %39 = vector.extract_strided_slice %36 {offsets = [0, 32], sizes = [16, 64], strides = [1, 1]} : vector<16x100xf32> to vector<16x64xf32>
    %40 = arith.truncf %39 : vector<16x64xf32> to vector<16x64xbf16>
    %41 = vector.extract_strided_slice %36 {offsets = [0, 96], sizes = [16, 4], strides = [1, 1]} : vector<16x100xf32> to vector<16x4xf32>
    %cst_20 = arith.constant dense<0.000000e+00> : vector<16x128xf32>
    %42 = tpu.matmul %38, %18, %cst_20 {dimension_numbers = #tpu.dot_dimension_numbers<[1], [1], [0], [0], [0, 0, 1, 0], [], []>} : vector<16x32xbf16>, vector<128x32xbf16>, vector<16x128xf32> -> vector<16x128xf32>
    %43 = vector.broadcast %4 : i32 to vector<1x128xi32>
    %44 = arith.cmpi slt, %0, %43 : vector<1x128xi32>
    %cst_21 = arith.constant -1.000000e+05 : f32
    %45 = vector.shape_cast %44 : vector<1x128xi1> to vector<1x128xi1>
    %46 = vector.broadcast %45 : vector<1x128xi1> to vector<16x128xi1>
    %47 = vector.broadcast %cst_21 : f32 to vector<16x128xf32>
    %48 = arith.select %46, %42, %47 : vector<16x128xi1>, vector<16x128xf32>
    %49 = arith.truncf %48 : vector<16x128xf32> to vector<16x128xbf16>
    %c0_22 = arith.constant 0 : index
    %c0_23 = arith.constant 0 : index
    %c0_24 = arith.constant 0 : index
    %50 = vector.load %arg9[%c0_22, %c0_23, %c0_24] : memref<1x16x128xbf16, #tpu.memory_space<vmem>>, vector<1x16x128xbf16>
    %51 = vector.shape_cast %50 : vector<1x16x128xbf16> to vector<16x128xbf16>
    %52 = vector.shape_cast %49 : vector<16x128xbf16> to vector<1x16x128xbf16>
    tpu.vector_store %arg9[%c0_22, %c0_23, %c0_24], %52 {strides = array<i32>} : memref<1x16x128xbf16, #tpu.memory_space<vmem>>, vector<1x16x128xbf16>,
    %53 = vector.extract_strided_slice %40 {offsets = [0, 0], sizes = [16, 16], strides = [1, 1]} : vector<16x64xbf16> to vector<16x16xbf16>
    %cst_25 = arith.constant dense<0.000000e+00> : vector<16x128xf32>
    %54 = tpu.matmul %53, %19, %cst_25 {dimension_numbers = #tpu.dot_dimension_numbers<[1], [1], [0], [0], [0, 0, 1, 0], [], []>} : vector<16x16xbf16>, vector<128x16xbf16>, vector<16x128xf32> -> vector<16x128xf32>
    %55 = vector.extract_strided_slice %41 {offsets = [0, 0], sizes = [16, 1], strides = [1, 1]} : vector<16x4xf32> to vector<16x1xf32>
    %56 = vector.broadcast %55 : vector<16x1xf32> to vector<16x128xf32>
    %57 = arith.addf %54, %56 : vector<16x128xf32>
    %58 = arith.truncf %57 : vector<16x128xf32> to vector<16x128xbf16>
    %c0_26 = arith.constant 0 : index
    %c0_27 = arith.constant 0 : index
    %c0_28 = arith.constant 0 : index
    %c0_29 = arith.constant 0 : index
    %59 = vector.load %arg10[%c0_26, %c0_27, %c0_28, %c0_29] : memref<1x4x16x128xbf16, #tpu.memory_space<vmem>>, vector<1x1x16x128xbf16>
    %60 = vector.shape_cast %59 : vector<1x1x16x128xbf16> to vector<16x128xbf16>
    %61 = vector.shape_cast %58 : vector<16x128xbf16> to vector<1x1x16x128xbf16>
    tpu.vector_store %arg10[%c0_26, %c0_27, %c0_28, %c0_29], %61 {strides = array<i32>} : memref<1x4x16x128xbf16, #tpu.memory_space<vmem>>, vector<1x1x16x128xbf16>,
    %62 = vector.extract_strided_slice %40 {offsets = [0, 16], sizes = [16, 16], strides = [1, 1]} : vector<16x64xbf16> to vector<16x16xbf16>
    %cst_30 = arith.constant dense<0.000000e+00> : vector<16x128xf32>
    %63 = tpu.matmul %62, %19, %cst_30 {dimension_numbers = #tpu.dot_dimension_numbers<[1], [1], [0], [0], [0, 0, 1, 0], [], []>} : vector<16x16xbf16>, vector<128x16xbf16>, vector<16x128xf32> -> vector<16x128xf32>
    %64 = vector.extract_strided_slice %41 {offsets = [0, 1], sizes = [16, 1], strides = [1, 1]} : vector<16x4xf32> to vector<16x1xf32>
    %65 = vector.broadcast %64 : vector<16x1xf32> to vector<16x128xf32>
    %66 = arith.addf %63, %65 : vector<16x128xf32>
    %67 = arith.truncf %66 : vector<16x128xf32> to vector<16x128xbf16>
    %c0_31 = arith.constant 0 : index
    %c1 = arith.constant 1 : index
    %c0_32 = arith.constant 0 : index
    %c0_33 = arith.constant 0 : index
    %68 = vector.load %arg10[%c0_31, %c1, %c0_32, %c0_33] : memref<1x4x16x128xbf16, #tpu.memory_space<vmem>>, vector<1x1x16x128xbf16>
    %69 = vector.shape_cast %68 : vector<1x1x16x128xbf16> to vector<16x128xbf16>
    %70 = vector.shape_cast %67 : vector<16x128xbf16> to vector<1x1x16x128xbf16>
    tpu.vector_store %arg10[%c0_31, %c1, %c0_32, %c0_33], %70 {strides = array<i32>} : memref<1x4x16x128xbf16, #tpu.memory_space<vmem>>, vector<1x1x16x128xbf16>,
    %71 = vector.extract_strided_slice %40 {offsets = [0, 32], sizes = [16, 16], strides = [1, 1]} : vector<16x64xbf16> to vector<16x16xbf16>
    %cst_34 = arith.constant dense<0.000000e+00> : vector<16x128xf32>
    %72 = tpu.matmul %71, %19, %cst_34 {dimension_numbers = #tpu.dot_dimension_numbers<[1], [1], [0], [0], [0, 0, 1, 0], [], []>} : vector<16x16xbf16>, vector<128x16xbf16>, vector<16x128xf32> -> vector<16x128xf32>
    %73 = vector.extract_strided_slice %41 {offsets = [0, 2], sizes = [16, 1], strides = [1, 1]} : vector<16x4xf32> to vector<16x1xf32>
    %74 = vector.broadcast %73 : vector<16x1xf32> to vector<16x128xf32>
    %75 = arith.addf %72, %74 : vector<16x128xf32>
    %76 = arith.truncf %75 : vector<16x128xf32> to vector<16x128xbf16>
    %c0_35 = arith.constant 0 : index
    %c2 = arith.constant 2 : index
    %c0_36 = arith.constant 0 : index
    %c0_37 = arith.constant 0 : index
    %77 = vector.load %arg10[%c0_35, %c2, %c0_36, %c0_37] : memref<1x4x16x128xbf16, #tpu.memory_space<vmem>>, vector<1x1x16x128xbf16>
    %78 = vector.shape_cast %77 : vector<1x1x16x128xbf16> to vector<16x128xbf16>
    %79 = vector.shape_cast %76 : vector<16x128xbf16> to vector<1x1x16x128xbf16>
    tpu.vector_store %arg10[%c0_35, %c2, %c0_36, %c0_37], %79 {strides = array<i32>} : memref<1x4x16x128xbf16, #tpu.memory_space<vmem>>, vector<1x1x16x128xbf16>,
    %80 = vector.extract_strided_slice %40 {offsets = [0, 48], sizes = [16, 16], strides = [1, 1]} : vector<16x64xbf16> to vector<16x16xbf16>
    %cst_38 = arith.constant dense<0.000000e+00> : vector<16x128xf32>
    %81 = tpu.matmul %80, %19, %cst_38 {dimension_numbers = #tpu.dot_dimension_numbers<[1], [1], [0], [0], [0, 0, 1, 0], [], []>} : vector<16x16xbf16>, vector<128x16xbf16>, vector<16x128xf32> -> vector<16x128xf32>
    %82 = vector.extract_strided_slice %41 {offsets = [0, 3], sizes = [16, 1], strides = [1, 1]} : vector<16x4xf32> to vector<16x1xf32>
    %83 = vector.broadcast %82 : vector<16x1xf32> to vector<16x128xf32>
    %84 = arith.addf %81, %83 : vector<16x128xf32>
    %85 = arith.truncf %84 : vector<16x128xf32> to vector<16x128xbf16>
    %c0_39 = arith.constant 0 : index
    %c3 = arith.constant 3 : index
    %c0_40 = arith.constant 0 : index
    %c0_41 = arith.constant 0 : index
    %86 = vector.load %arg10[%c0_39, %c3, %c0_40, %c0_41] : memref<1x4x16x128xbf16, #tpu.memory_space<vmem>>, vector<1x1x16x128xbf16>
    %87 = vector.shape_cast %86 : vector<1x1x16x128xbf16> to vector<16x128xbf16>
    %88 = vector.shape_cast %85 : vector<16x128xbf16> to vector<1x1x16x128xbf16>
    tpu.vector_store %arg10[%c0_39, %c3, %c0_40, %c0_41], %88 {strides = array<i32>} : memref<1x4x16x128xbf16, #tpu.memory_space<vmem>>, vector<1x1x16x128xbf16>,
    return
  }
  func.func @transform_0(%arg0: i32, %arg1: memref<2xi32, #tpu.memory_space<smem>>) -> (i32, i32, i32) {
    %c0_i32 = arith.constant 0 : i32
    %c0_i32_0 = arith.constant 0 : i32
    %c0_i32_1 = arith.constant 0 : i32
    return %arg0, %c0_i32, %c0_i32_0 : i32, i32, i32
  }
  func.func @transform_1(%arg0: i32, %arg1: memref<2xi32, #tpu.memory_space<smem>>) -> (i32, i32) {
    %c0_i32 = arith.constant 0 : i32
    %c0_i32_0 = arith.constant 0 : i32
    %c0_i32_1 = arith.constant 0 : i32
    return %c0_i32, %c0_i32_0 : i32, i32
  }
  func.func @transform_2(%arg0: i32, %arg1: memref<2xi32, #tpu.memory_space<smem>>) -> (i32, i32) {
    %c0_i32 = arith.constant 0 : i32
    %c0_i32_0 = arith.constant 0 : i32
    %c0_i32_1 = arith.constant 0 : i32
    return %c0_i32, %c0_i32_0 : i32, i32
  }
  func.func @transform_3(%arg0: i32, %arg1: memref<2xi32, #tpu.memory_space<smem>>) -> (i32, i32) {
    %c0_i32 = arith.constant 0 : i32
    %c0_i32_0 = arith.constant 0 : i32
    %c0_i32_1 = arith.constant 0 : i32
    return %c0_i32, %c0_i32_0 : i32, i32
  }
  func.func @transform_4(%arg0: i32, %arg1: memref<2xi32, #tpu.memory_space<smem>>) -> (i32, i32) {
    %c0_i32 = arith.constant 0 : i32
    %c0_i32_0 = arith.constant 0 : i32
    %c0_i32_1 = arith.constant 0 : i32
    return %c0_i32, %c0_i32_0 : i32, i32
  }
  func.func @transform_5(%arg0: i32, %arg1: memref<2xi32, #tpu.memory_space<smem>>) -> (i32, i32) {
    %c0_i32 = arith.constant 0 : i32
    %c0_i32_0 = arith.constant 0 : i32
    %c0_i32_1 = arith.constant 0 : i32
    return %c0_i32, %c0_i32_0 : i32, i32
  }
  func.func @transform_6(%arg0: i32, %arg1: memref<2xi32, #tpu.memory_space<smem>>) -> (i32, i32) {
    %c0_i32 = arith.constant 0 : i32
    %c0_i32_0 = arith.constant 0 : i32
    %c0_i32_1 = arith.constant 0 : i32
    return %c0_i32, %c0_i32_0 : i32, i32
  }
  func.func @transform_7(%arg0: i32, %arg1: memref<2xi32, #tpu.memory_space<smem>>) -> (i32, i32, i32) {
    %c0_i32 = arith.constant 0 : i32
    %c0_i32_0 = arith.constant 0 : i32
    %c0_i32_1 = arith.constant 0 : i32
    return %arg0, %c0_i32, %c0_i32_0 : i32, i32, i32
  }
  func.func @transform_8(%arg0: i32, %arg1: memref<2xi32, #tpu.memory_space<smem>>) -> (i32, i32, i32, i32) {
    %c0_i32 = arith.constant 0 : i32
    %c0_i32_0 = arith.constant 0 : i32
    %c0_i32_1 = arith.constant 0 : i32
    %c0_i32_2 = arith.constant 0 : i32
    return %arg0, %c0_i32, %c0_i32_0, %c0_i32_1 : i32, i32, i32, i32
  }
}

</mosaic_0001>

<bundles_post_ra>
// kernel: biaffine_ae_forward.1
= control target key start
LH: loop header
LB: loop body
LE: loop exit
PB: predicated region body
PF: predicated region fallthrough
CT: control target
= control target key end

     0   :  { %s1967_s30 = smov [#allocation3]   ;;  %s2367_s0 = inlined_call_operand.hbm [shape: s32[2], index: 0, kind: input, shape index: {}]   ;;  %s2368_s1 = inlined_call_operand.vmem [shape: bf16[2,128,32], index: 1, kind: input, shape index: {}]   ;;  %s2369_s2 = inlined_call_operand.hbm [shape: bf16[32,48], index: 2, kind: input, shape index: {}]   ;;  %s2370_s3 = inlined_call_operand.hbm [shape: f32[1,48], index: 3, kind: input, shape index: {}]   ;;  %s2371_s4 = inlined_call_operand.hbm [shape: bf16[32,48], index: 4, kind: input, shape index: {}]   ;;  %s2372_s5 = inlined_call_operand.hbm [shape: f32[1,48], index: 5, kind: input, shape index: {}]   ;;  %s2373_s6 = inlined_call_operand.hbm [shape: bf16[48,100], index: 6, kind: input, shape index: {}]   ;;  %s2374_s7 = inlined_call_operand.hbm [shape: f32[1,100], index: 7, kind: input, shape index: {}]   ;;  %s2375_s8 = inlined_call_operand.vmem [shape: bf16[2,16,128], index: 8, kind: output, shape index: {0}]   ;;  %s2376_s9 = inlined_call_operand.vmem [shape: bf16[2,4,16,128], index: 9, kind: output, shape index: {1}]  }
   0x1   :  { %16 = dma.hbm_to_smem %s2367_s0, 16, %s1967_s30, [#allocation2] }
   0x2   :  { %1945 = dma.done.wait [#allocation2], 16 }
   0x3   :  { %1946 = vsyncadd [#allocation2], 4294967280 }
   0x4   :  { %18 = sfence }
   0x5   :  { %19 = vsyncpa [#allocation5], 0 }
   0x6   :  { %20 = vsyncpa [#allocation7], 0 }
   0x7   :  { %21 = vsyncpa [#allocation10], 0 }
   0x8   :  { %22 = vsyncpa [#allocation13], 0  ;;  %s2039_s12 = smov 0  }
   0x9 LB: > { %s1968_s13 = smov [#allocation6]   ;;  %s2045_s0 = sadd.s32 4294967295, %s1965_s12   ;;  %s1965_s12 = sphi %s2039_s12, %s28_s12  }
   0xa   : > { %s263_s14 = sshll.u32 %s1968_s13, 4  ;;  %p1360_p0 = scmp.ge.s32.totalorder %s1965_s12, 1  ;;  %s264_s14 = int_to_ptr.vmem [resolvable:$true] %s263_s14 }
   0xb   : > { %p237_p1 = scmp.lt.s32.totalorder %s1965_s12, 3  ;;  %p1716_p2 = scmp.eq.s32.totalorder %s2045_s0, 0 }
   0xc   : > { %s1969_s16 = smov [#allocation9]   ;;  %s1970_s18 = smov [#allocation4]  }
   0xd   : > { %p2050_p3 = pnand %p1360_p0, %p237_p1  ;;  %s287_s17 = sshll.u32 %s1969_s16, 4  ;;  %s2056_s17 = int_to_ptr.vmem [resolvable:$true] %s287_s17 }
   0xe   : > { %s249_s19 = sshll.u32 %s1970_s18, 4  ;;  %s1971_s21 = smov [#allocation8]   ;;  %s2064_s19 = int_to_ptr.vmem [resolvable:$true] %s249_s19 }
   0xf   : > { %p1697_p4 = pneg %p2050_p3  ;;  %s2066_s22 = sshll.u32 %s1971_s21, 4  ;;  %s274_s22 = int_to_ptr.vmem [resolvable:$true] %s2066_s22 }
  0x10   : > { %s1796_s24 = scalar_lea.vmem %s264_s14, 16  ;;  %s1803_s25 = scalar_lea.vmem %s264_s14, 32 }
  0x11   : > { %p2060_p5 = pnand %p1716_p2, %p1697_p4  ;;  %p1797_p7 = scmp.ne.s32.totalorder %s264_s14, %s1796_s24 }
  0x12   : > { %p1804_p10 = scmp.lt.s32.totalorder %s264_s14, %s264_s14  ;;  %p1805_p11 = scmp.lt.s32.totalorder %s1803_s25, %s1796_s24 }
  0x13   : > { %p2070_p6 = pneg %p2060_p5 }
  0x14   : > { %p1806_p12 = por %p1805_p11, %p1804_p10 }
  0x15   : > { %p1799_p8 = pnand %p1797_p7, %p2070_p6 }
  0x17   : > { %p1800_p9 = pneg %p1799_p8 }
  0x19   : > { %p1807_p13 = pnand %p1806_p12, %p1800_p9 }
  0x1b   : > { %1810 = shalt.err (!%p1807_p13)
}
  0x1c   : > { %1703 = dma.hbm_to_vmem [thread:$0]  (!%p2060_p5), %s2370_s3, 16, %s264_s14, [#allocation7]  }
  0x1d   : > { %s1822_s28 = scalar_lea.vmem %s2056_s17, 16  ;;  %s1829_s29 = scalar_lea.vmem %s2056_s17, 32 }
  0x1e   : > { %p1823_p0 = scmp.ne.s32.totalorder %s2056_s17, %s1822_s28  ;;  %p1830_p7 = scmp.lt.s32.totalorder %s2056_s17, %s2056_s17 }
  0x1f   : > { %p1831_p8 = scmp.lt.s32.totalorder %s1829_s29, %s1822_s28 }
  0x20   : > { %p1825_p1 = pnand %p1823_p0, %p2070_p6 }
  0x21   : > { %p1832_p9 = por %p1831_p8, %p1830_p7 }
  0x22   : > { %p1826_p4 = pneg %p1825_p1 }
  0x24   : > { %p1833_p10 = pnand %p1832_p9, %p1826_p4 }
  0x26   : > { %1836 = shalt.err (!%p1833_p10)
}
  0x27   : > { %1709 = dma.hbm_to_vmem [thread:$0]  (!%p2060_p5), %s2372_s5, 16, %s2056_s17, [#allocation10]  }
  0x28   : > { %s1848_s11 = scalar_lea.vmem %s2064_s19, 256  ;;  %p1856_p0 = scmp.lt.s32.totalorder %s2064_s19, %s2064_s19 }
  0x29   : > { %p1849_p11 = scmp.ne.s32.totalorder %s2064_s19, %s1848_s11  ;;  %p1857_p1 = scmp.lt.s32.totalorder %s1848_s11, %s1848_s11 }
  0x2b   : > { %p1851_p12 = pnand %p1849_p11, %p2070_p6  ;;  %p1858_p4 = por %p1857_p1, %p1856_p0 }
  0x2d   : > { %p1852_p13 = pneg %p1851_p12 }
  0x2f   : > { %p1859_p7 = pnand %p1858_p4, %p1852_p13 }
  0x31   : > { %1862 = shalt.err (!%p1859_p7)
}
  0x32   : > { %s1972_s13 = smov 64   ;;  %s1973_s14 = smov 4  }
  0x33   : > { %1700 = dma.hbm_to_vmem [thread:$0]  (!%p2060_p5), %s2369_s2, 256, %s2064_s19, [#allocation5], %s1972_s13, %s1972_s13, %s1973_s14  }
  0x34   : > { %s1874_s18 = scalar_lea.vmem %s274_s22, 256  ;;  %p1882_p11 = scmp.lt.s32.totalorder %s274_s22, %s274_s22 }
  0x35   : > { %p1875_p8 = scmp.ne.s32.totalorder %s274_s22, %s1874_s18  ;;  %p1883_p12 = scmp.lt.s32.totalorder %s1874_s18, %s1874_s18 }
  0x37   : > { %p1877_p9 = pnand %p1875_p8, %p2070_p6  ;;  %p1884_p13 = por %p1883_p12, %p1882_p11 }
  0x39   : > { %p1878_p10 = pneg %p1877_p9 }
  0x3b   : > { %p1885_p0 = pnand %p1884_p13, %p1878_p10 }
  0x3d   : > { %1888 = shalt.err (!%p1885_p0)
}
  0x3e   : > { %1706 = dma.hbm_to_vmem [thread:$0]  (!%p2060_p5), %s2371_s4, 256, %s274_s22, [#allocation7], %s1972_s13, %s1972_s13, %s1973_s14  }
  0x3f   : > { %s1974_s19 = smov [#allocation11]   ;;  %s1975_s26 = smov [#allocation12]  }
  0x40   : > { %s297_s25 = sshll.u32 %s1974_s19, 4  ;;  %s311_s27 = sshll.u32 %s1975_s26, 4  ;;  %s298_s25 = int_to_ptr.vmem [resolvable:$true] %s297_s25  ;;  %s312_s27 = int_to_ptr.vmem [resolvable:$true] %s311_s27 }
  0x41   : > { %s1900_s28 = scalar_lea.vmem %s298_s25, 384  ;;  %p1908_p8 = scmp.lt.s32.totalorder %s298_s25, %s298_s25 }
  0x42   : > { %p1901_p1 = scmp.ne.s32.totalorder %s298_s25, %s1900_s28  ;;  %p1909_p9 = scmp.lt.s32.totalorder %s1900_s28, %s1900_s28 }
  0x44   : > { %p1903_p4 = pnand %p1901_p1, %p2070_p6  ;;  %p1910_p10 = por %p1909_p9, %p1908_p8 }
  0x46   : > { %p1904_p7 = pneg %p1903_p4 }
  0x48   : > { %p1911_p11 = pnand %p1910_p10, %p1904_p7 }
  0x4a   : > { %1914 = shalt.err (!%p1911_p11)
}
  0x4b   : > { %1712 = dma.hbm_to_vmem [thread:$0]  (!%p2060_p5), %s2373_s6, 384, %s298_s25, [#allocation10], %s1972_s13, %s1972_s13, %s1973_s14  }
  0x4c   : > { %s1926_s30 = scalar_lea.vmem %s312_s27, 16  ;;  %s1933_s10 = scalar_lea.vmem %s312_s27, 32 }
  0x4d   : > { %p1927_p12 = scmp.ne.s32.totalorder %s312_s27, %s1926_s30  ;;  %p1934_p1 = scmp.lt.s32.totalorder %s312_s27, %s312_s27 }
  0x4e   : > { %p1935_p4 = scmp.lt.s32.totalorder %s1933_s10, %s1926_s30 }
  0x4f   : > { %p1929_p13 = pnand %p1927_p12, %p2070_p6 }
  0x50   : > { %p1936_p7 = por %p1935_p4, %p1934_p1 }
  0x51   : > { %p1930_p0 = pneg %p1929_p13 }
  0x53   : > { %p1937_p8 = pnand %p1936_p7, %p1930_p0 }
  0x55   : > { %1940 = shalt.err (!%p1937_p8)
}
  0x56   : > { %1715 = dma.hbm_to_vmem [thread:$0]  (!%p2060_p5), %s2374_s7, 16, %s312_s27, [#allocation13]  }
  0x57   : > { %332 = sbr.rel (%p2050_p3) target bundleno = 927 (0x39f), region = 48 }
  0x5c   : > { %1948 = dma.done.wait (%p1716_p2), [#allocation5], 256  }
  0x5d   : > { %1950 = vsyncadd (%p1716_p2), [#allocation5], 4294967040 }
  0x5e   : > { %1952 = dma.done.wait (%p1716_p2), [#allocation7], 272  }
  0x5f   : > { %1954 = vsyncadd (%p1716_p2), [#allocation7], 4294967024 }
  0x60   : > { %1956 = dma.done.wait (%p1716_p2), [#allocation10], 400  }
  0x61   : > { %1958 = vsyncadd (%p1716_p2), [#allocation10], 4294966896 }
  0x62   : > { %1960 = dma.done.wait (%p1716_p2), [#allocation13], 16  }
  0x63   : > { %1962 = vsyncadd (%p1716_p2), [#allocation13], 4294967280  ;;  %p391_p3 = scmp.lt.s32.totalorder %s2045_s0, 1  ;;  %v1976_v0 = vmov 0.0   ;;  %vm1977_vm0 = vmmov 0   ;;  %v1762_v1 = vld [vmem:[#allocation4 + $0x8] sm:$0xff]  }
  0x64   : > { %1573 = vmatprep.subr.bf16.mxu0 %v1976_v0  ;;  %1589 = vmatprep.mubr.msk.bf16.mxu0 %vm1977_vm0, %v1976_v0  ;;  %v1763_v2 = vld [vmem:[#allocation4] sm:$0xff]   ;;  %vm489_vm1 = vcmask 261120   ;;  %v1771_v7 = vld [vmem:[#allocation8] sm:$0xff]   ;;  %v2189_v24 = vld [vmem:[#allocation6] ss:$0 sm:$0xff]  ;;  %s1978_s17 = smov 96  }
  0x65   : > { %s2160_s15 = scalar_select %p391_p3, %s2045_s0, 1  ;;  %1535 = vmatprep.subr.bf16.mxu1 %v1762_v1  ;;  %v1766_v5 = vld [vmem:[#allocation8 + $0x8] sm:$0xff]   ;;  %v1775_v14 = vld [vmem:[#allocation11 + $0x8] sm:$0xff]   ;;  %v1776_v15 = vld [vmem:[#allocation11] sm:$0xff]  }
  0x66   : > { %1536 = vmatpush3.bf16.msra.mxu1 %v1762_v1  ;;  %v1774_v13 = vld [vmem:[#allocation11 + $0x10] sm:$0xff]   ;;  %v1400_v59 = vld [vmem:[#allocation9] ss:$0 sm:$0xff]  ;;  %s1980_s18 = smov 80   ;;  %s1981_s21 = smov 64  }
  0x67   : > { %s1432_s20 = sshll.u32 %s2160_s15, 6  ;;  %1537 = vmatprep.subr.bf16.mxu1 %v1763_v2  ;;  %s1982_s24 = smov 48  }
  0x68   : > { %s395_s14 = scalar_lea.vmem %s2368_s1, %s1432_s20  ;;  %s409_s19 = sld [smem:[#allocation3 + %s2045_s0]] }
  0x69   : > { %v1764_v3 = vld [vmem:[%s395_s14] sm:$0xff]   ;;  %v1765_v4 = vld [vmem:[%s395_s14 + $0x8] sm:$0xff]   ;;  %v1767_v6 = vld [vmem:[%s395_s14 + $0x10] sm:$0xff]   ;;  %s1433_s25 = sshll.u32 %s2160_s15, 3  ;;  %s1434_s0 = sshll.u32 %s2160_s15, 5 }
  0x6a   : > { %1539 = vmatprep.mubr.msk.bf16.mxu1 %vm489_vm1, %v1764_v3  ;;  %1538 = vmatpush3.bf16.msra.mxu1 %v1763_v2  ;;  %v1768_v8 = vld [vmem:[%s395_s14 + $0x18] sm:$0xff]   ;;  %v1769_v9 = vld [vmem:[%s395_s14 + $0x20] sm:$0xff]   ;;  %v1770_v10 = vld [vmem:[%s395_s14 + $0x28] sm:$0xff]   ;;  %s400_s28 = scalar_lea.vmem %s2375_s8, %s1433_s25  ;;  %s405_s30 = scalar_lea.vmem %s2376_s9, %s1434_s0 }
  0x6b   : > { %1555 = vmatprep.subr.bf16.mxu1 %v1976_v0  ;;  %v1772_v11 = vld [vmem:[%s395_s14 + $0x30] sm:$0xff]   ;;  %v1773_v12 = vld [vmem:[%s395_s14 + $0x38] sm:$0xff]  }
  0x6d   : > { %1540 = vmatmul.mubr.msk.bf16.vlgmr.msra.gmra.mxu1 %vm489_vm1, %v1765_v4 }
  0x6e   : > { %1556 = vmatpush3.bf16.msra.mxu1 %v1766_v5  ;;  %1543 = vmatprep.mubr.msk.bf16.mxu1 %vm489_vm1, %v1767_v6 }
  0x6f   : > { %1557 = vmatprep.subr.bf16.mxu1 %v1976_v0 }
  0x72   : > { %1558 = vmatpush3.bf16.msra.mxu1 %v1771_v7 }
  0x73   : > { %1563 = vmatprep.subr.bf16.mxu1 %v1976_v0 }
  0x75   : > { %1544 = vmatmul.mubr.msk.bf16.gmra.mxu1 %vm489_vm1, %v1768_v8 }
  0x76   : > { %1547 = vmatprep.mubr.msk.bf16.mxu1 %vm489_vm1, %v1769_v9 }
  0x7d   : > { %1548 = vmatmul.mubr.msk.bf16.gmra.mxu1 %vm489_vm1, %v1770_v10 }
  0x7e   : > { %1551 = vmatprep.mubr.msk.bf16.mxu1 %vm489_vm1, %v1772_v11 }
  0x85   : > { %1552 = vmatmul.mubr.msk.bf16.gmra.mxu1 %vm489_vm1, %v1773_v12 }
  0x86   : > { %1559 = vmatprep.mubr.msk.bf16.mxu1 %vm1977_vm0, %v1976_v0 }
  0x8d   : > { %1560 = vmatmul.mubr.msk.bf16.vlgmr.msra.gmra.mxu1 %vm489_vm1, %v1764_v3 }
  0x8e   : > { %1569 = vmatprep.mubr.msk.bf16.mxu1 %vm1977_vm0, %v1976_v0  ;;  %1564 = vmatpush3.bf16.msra.mxu1 %v1774_v13 }
  0x8f   : > { %1565 = vmatprep.subr.bf16.mxu1 %v1976_v0 }
  0x92   : > { %1566 = vmatpush3.bf16.msra.mxu1 %v1775_v14 }
  0x93   : > { %1567 = vmatprep.subr.bf16.mxu1 %v1976_v0 }
  0x96   : > { %1568 = vmatpush3.bf16.msra.mxu1 %v1776_v15 }
  0x97   : > { %1593 = vmatprep.subr.bf16.mxu1 %v1976_v0 }
 0x12d   : > { %v2185_v16 = vpop.f32.mrf.mxu1 }
 0x12f   : > { %v548_v17 = vpop.f32.mrf.mxu1 }
 0x130   : > { %v2195_v32 = vadd.f32 %v2189_v24, %v548_v17  ;;  %v557_v17 = vadd.f32 %v2185_v16, %v2189_v24 }
 0x131   : > { %v2187_v18 = vpop.f32.mrf.mxu1 }
 0x132   : > { %vm611_vm6 = vcmp.ge.f32.partialorder %v2195_v32, 0.0  ;;  %v627_v47 = vmul.f32 0.1, %v2195_v32  ;;  %v560_v12 = vadd.f32 %v2187_v18, %v2189_v24 }
 0x133   : > { %v551_v19 = vpop.f32.mrf.mxu1 }
 0x134   : > { %v552_v44 = vadd.f32 %v2189_v24, %v551_v19 }
 0x135   : > { %v1545_v20 = vpop.f32.mrf.mxu1 }
 0x136   : > { %vm612_vm10 = vcmp.ge.f32.partialorder %v552_v44, 0.0  ;;  %v628_v56 = vmul.f32 0.1, %v552_v44  ;;  %v573_v1 = vadd.f32 %v1545_v20, %v2189_v24 }
 0x137   : > { %v564_v21 = vpop.f32.mrf.mxu1 }
 0x138   : > { %v565_v37 = vadd.f32 %v2189_v24, %v564_v21  ;;  %v644_v15 = vsel %vm612_vm10, %v552_v44, %v628_v56  ;;  %v643_v21 = vsel %vm611_vm6, %v2195_v32, %v627_v47  ;;  %v633_v18 = vmul.f32 0.1, %v573_v1 }
 0x139   : > { %v1546_v22 = vpop.f32.mrf.mxu1  ;;  %vm617_vm15 = vcmp.ge.f32.partialorder %v573_v1, 0.0  ;;  %vm613_vm6 = vcmp.ge.f32.partialorder %v557_v17, 0.0 }
 0x13a   : > { %v631_v50 = vmul.f32 0.1, %v565_v37  ;;  %vm615_vm8 = vcmp.ge.f32.partialorder %v565_v37, 0.0  ;;  %v576_v57 = vadd.f32 %v1546_v22, %v2189_v24 }
 0x13b   : > { %v567_v23 = vpop.f32.mrf.mxu1 }
 0x13c   : > { %v568_v34 = vadd.f32 %v2189_v24, %v567_v23  ;;  %v647_v5 = vsel %vm615_vm8, %v565_v37, %v631_v50  ;;  %v634_v13 = vmul.f32 0.1, %v576_v57  ;;  %vm618_vm14 = vcmp.ge.f32.partialorder %v576_v57, 0.0 }
 0x13d   : > { %v1549_v25 = vpop.f32.mrf.mxu1 }
 0x13e   : > { %v589_v26 = vadd.f32 %v1549_v25, %v2189_v24  ;;  %v632_v48 = vmul.f32 0.1, %v568_v34  ;;  %vm616_vm7 = vcmp.ge.f32.partialorder %v568_v34, 0.0 }
 0x13f   : > { %v580_v27 = vpop.f32.mrf.mxu1 }
 0x140   : > { %v637_v28 = vmul.f32 0.1, %v589_v26  ;;  %v581_v29 = vadd.f32 %v2189_v24, %v580_v27  ;;  %vm621_vm2 = vcmp.ge.f32.partialorder %v589_v26, 0.0  ;;  %v648_v63 = vsel %vm616_vm7, %v568_v34, %v632_v48 }
 0x141   : > { %v1550_v30 = vpop.f32.mrf.mxu1  ;;  %v661_v11 = vpack.c.bf16 %v648_v63, %v647_v5  ;;  %v630_v27 = vmul.f32 0.1, %v560_v12  ;;  %vm936_vm7 = vcmask 130048  }
 0x142   : > { %v592_v31 = vadd.f32 %v1550_v30, %v2189_v24  ;;  %v635_v38 = vmul.f32 0.1, %v581_v29  ;;  %v653_v40 = vsel %vm621_vm2, %v589_v26, %v637_v28  ;;  %vm619_vm5 = vcmp.ge.f32.partialorder %v581_v29, 0.0 }
 0x143   : > { %v583_v33 = vpop.f32.mrf.mxu1  ;;  %v659_v26 = vpack.c.bf16 %v644_v15, %v643_v21  ;;  %v629_v30 = vmul.f32 0.1, %v557_v17  ;;  %v407_v15 = vlaneseq }
 0x144   : > { %v638_v35 = vmul.f32 0.1, %v592_v31  ;;  %v584_v36 = vadd.f32 %v2189_v24, %v583_v33  ;;  %vm622_vm3 = vcmp.ge.f32.partialorder %v592_v31, 0.0  ;;  %v651_v55 = vsel %vm619_vm5, %v581_v29, %v635_v38 }
 0x145   : > { %v1553_v39 = vpop.f32.mrf.mxu1  ;;  %v650_v29 = vsel %vm618_vm14, %v576_v57, %v634_v13  ;;  %vm769_vm5 = vcmask 392192   ;;  %v649_v33 = vsel %vm617_vm15, %v573_v1, %v633_v18  ;;  %v645_v38 = vsel %vm613_vm6, %v557_v17, %v629_v30  ;;  %v1404_v1 = vld [vmem:[#allocation12] ss:$0 sm:$0xff] }
 0x146   : > { %vm620_vm4 = vcmp.ge.f32.partialorder %v584_v36, 0.0  ;;  %v636_v41 = vmul.f32 0.1, %v584_v36  ;;  %v605_v42 = vadd.f32 %v1553_v39, %v2189_v24  ;;  %v654_v43 = vsel %vm622_vm3, %v592_v31, %v638_v35 }
 0x147   : > { %v596_v45 = vpop.f32.mrf.mxu1  ;;  %v2202_v46 = vpack.c.bf16 %v654_v43, %v653_v40  ;;  %v662_v35 = vpack.c.bf16 %v650_v29, %v649_v33  ;;  %v825_v43 = vsel %vm489_vm1, %v661_v11, 0  ;;  %v408_v17 = vand.u32 127, %v407_v15 }
 0x148   : > { %v652_v49 = vsel %vm620_vm4, %v584_v36, %v636_v41  ;;  %v641_v51 = vmul.f32 0.1, %v605_v42  ;;  %v597_v52 = vadd.f32 %v2189_v24, %v596_v45  ;;  %vm625_vm9 = vcmp.ge.f32.partialorder %v605_v42, 0.0 }
 0x149   : > { %930 = vrot.lane.b32.xlu1 %v2202_v46, %s1978_s17  ;;  %v1554_v53 = vpop.f32.mrf.mxu1  ;;  %v2212_v60 = vpack.c.bf16 %v652_v49, %v651_v55  ;;  %vm614_vm4 = vcmp.ge.f32.partialorder %v560_v12, 0.0  ;;  %v834_v40 = vsel %vm489_vm1, %v2202_v46, 0  ;;  %v819_v45 = vsel %vm489_vm1, %v659_v26, 0 }
 0x14a   : > { %v608_v54 = vadd.f32 %v1554_v53, %v2189_v24  ;;  %v639_v2 = vmul.f32 0.1, %v597_v52  ;;  %v657_v4 = vsel %vm625_vm9, %v605_v42, %v641_v51  ;;  %vm623_vm13 = vcmp.ge.f32.partialorder %v597_v52, 0.0 }
 0x14b   : > { %v599_v58 = vpop.f32.mrf.mxu1  ;;  %v646_v36 = vsel %vm614_vm4, %v560_v12, %v630_v27  ;;  %v831_v41 = vsel %vm489_vm1, %v2212_v60, 0  ;;  %v828_v42 = vsel %vm489_vm1, %v662_v35, 0  ;;  %v1979_v46 = vmov 96  }
 0x14c   : > { %v642_v61 = vmul.f32 0.1, %v608_v54  ;;  %v600_v62 = vadd.f32 %v2189_v24, %v599_v58  ;;  %vm626_vm11 = vcmp.ge.f32.partialorder %v608_v54, 0.0  ;;  %v655_v25 = vsel %vm623_vm13, %v597_v52, %v639_v2  ;;  %1756 = vset.pattern.permute.xlu1 %v1979_v46  ;;  %1755 = vset.pattern.permute.xlu0 %v1979_v46 }
 0x14d   : > { %v724_v3 = vpop.f32.mrf.mxu1  ;;  %928 = vrot.lane.b32.xlu1 %v2212_v60, %s1978_s17  ;;  %v660_v39 = vpack.c.bf16 %v646_v36, %v645_v38 }
 0x14e   : > { %vm624_vm12 = vcmp.ge.f32.partialorder %v600_v62, 0.0  ;;  %v640_v6 = vmul.f32 0.1, %v600_v62  ;;  %v725_v7 = vadd.f32 %v1400_v59, %v724_v3  ;;  %v658_v8 = vsel %vm626_vm11, %v608_v54, %v642_v61 }
 0x14f   : > { %v1561_v9 = vpop.f32.mrf.mxu1  ;;  %v666_v10 = vpack.c.bf16 %v658_v8, %v657_v4  ;;  %v822_v44 = vsel %vm489_vm1, %v660_v39, 0  ;;  %v1983_v8 = vmov 97  }
 0x150   : > { %v656_v14 = vsel %vm624_vm12, %v600_v62, %v640_v6  ;;  %v733_v22 = vmul.f32 0.1, %v725_v7  ;;  %vm731_vm2 = vcmp.ge.f32.partialorder %v725_v7, 0.0  ;;  %v1984_v9 = vmov 99  }
 0x151   : > { %934 = vrot.lane.b32.xlu0 %v666_v10, %s1978_s17  ;;  %v727_v19 = vpop.f32.mrf.mxu1  ;;  %924 = vrot.lane.b32.xlu1 %v661_v11, %s1978_s17  ;;  %v840_v20 = vsel %vm489_vm1, %v666_v10, 0  ;;  %v665_v24 = vpack.c.bf16 %v656_v14, %v655_v25  ;;  %v1985_v10 = vmov 98  }
 0x152   : > { %v728_v23 = vadd.f32 %v1400_v59, %v727_v19  ;;  %1574 = vmatpush3.bf16.xpose.msra.mxu0 %v840_v20  ;;  %v735_v31 = vsel %vm731_vm2, %v725_v7, %v733_v22  ;;  %v883_v19 = vstv %s409_s19 }
 0x153   : > { %v1562_v16 = vpop.f32.mrf.mxu1  ;;  %1575 = vmatprep.subr.bf16.mxu0 %v1976_v0  ;;  %v837_v37 = vsel %vm489_vm1, %v665_v24, 0 }
 0x154   : > { %vm732_vm3 = vcmp.ge.f32.partialorder %v728_v23, 0.0  ;;  %v734_v28 = vmul.f32 0.1, %v728_v23 }
 0x155   : > { %932 = vrot.lane.b32.xlu0 %v665_v24, %s1978_s17  ;;  %920 = vrot.lane.b32.xlu1 %v659_v26, %s1978_s17 }
 0x156   : > { %v736_v32 = vsel %vm732_vm3, %v728_v23, %v734_v28 }
 0x157   : > { %v737_v34 = vpack.c.bf16 %v736_v32, %v735_v31 }
 0x159   : > { %1570 = vmatmul.mubr.msk.bf16.vlgmr.msra.gmra.mxu1 %vm769_vm5, %v737_v34  ;;  %926 = vrot.lane.b32.xlu0 %v662_v35, %s1978_s17 }
 0x15a   : > { %1576 = vmatpush3.bf16.xpose.msra.mxu0 %v837_v37  ;;  %1609 = vmatprep.mubr.msk.bf16.mxu1 %vm1977_vm0, %v1976_v0 }
 0x15b   : > { %1577 = vmatprep.subr.bf16.mxu0 %v1976_v0 }
 0x15d   : > { %922 = vrot.lane.b32.xlu0 %v660_v39, %s1978_s17 }
 0x162   : > { %1578 = vmatpush3.bf16.xpose.msra.mxu0 %v834_v40 }
 0x163   : > { %1579 = vmatprep.subr.bf16.mxu0 %v1976_v0 }
 0x16a   : > { %1580 = vmatpush3.bf16.xpose.msra.mxu0 %v831_v41 }
 0x16b   : > { %1581 = vmatprep.subr.bf16.mxu0 %v1976_v0 }
 0x172   : > { %1582 = vmatpush3.bf16.xpose.msra.mxu0 %v828_v42 }
 0x173   : > { %1583 = vmatprep.subr.bf16.mxu0 %v1976_v0 }
 0x17a   : > { %1584 = vmatpush3.bf16.xpose.msra.mxu0 %v825_v43 }
 0x17b   : > { %1585 = vmatprep.subr.bf16.mxu0 %v1976_v0 }
 0x182   : > { %1586 = vmatpush3.bf16.xpose.msra.mxu0 %v822_v44 }
 0x183   : > { %1587 = vmatprep.subr.bf16.mxu0 %v1976_v0 }
 0x18a   : > { %1588 = vmatpush3.bf16.xpose.msra.mxu0 %v819_v45 }
 0x18b   : > { %1613 = vmatprep.subr.bf16.mxu0 %v1976_v0 }
 0x1bb   : > { %v931_v51 = vpop.permute.xlu1 %930 }
 0x1bc   : > { %v2268_v52 = vsel %vm936_vm7, %v931_v51, 0 }
 0x1bf   : > { %v929_v53 = vpop.permute.xlu1 %928 }
 0x1c0   : > { %v2273_v54 = vsel %vm936_vm7, %v929_v53, 0 }
 0x1c3   : > { %v935_v47 = vpop.permute.xlu0 %934  ;;  %v925_v57 = vpop.permute.xlu1 %924 }
 0x1c4   : > { %v2258_v48 = vsel %vm936_vm7, %v935_v47, 0  ;;  %v2283_v58 = vsel %vm936_vm7, %v925_v57, 0 }
 0x1c5   : > { %1594 = vmatpush3.bf16.xpose.msra.mxu1 %v2258_v48 }
 0x1c6   : > { %1595 = vmatprep.subr.bf16.mxu1 %v1976_v0 }
 0x1c7   : > { %v933_v49 = vpop.permute.xlu0 %932  ;;  %v921_v61 = vpop.permute.xlu1 %920 }
 0x1c8   : > { %v2263_v50 = vsel %vm936_vm7, %v933_v49, 0  ;;  %v2293_v62 = vsel %vm936_vm7, %v921_v61, 0 }
 0x1cb   : > { %v927_v55 = vpop.permute.xlu0 %926 }
 0x1cc   : > { %v2278_v56 = vsel %vm936_vm7, %v927_v55, 0 }
 0x1cd   : > { %1596 = vmatpush3.bf16.xpose.msra.mxu1 %v2263_v50 }
 0x1ce   : > { %1597 = vmatprep.subr.bf16.mxu1 %v1976_v0 }
 0x1cf   : > { %v923_v59 = vpop.permute.xlu0 %922 }
 0x1d0   : > { %v2288_v60 = vsel %vm936_vm7, %v923_v59, 0 }
 0x1d5   : > { %1598 = vmatpush3.bf16.xpose.msra.mxu1 %v2268_v52 }
 0x1d6   : > { %1599 = vmatprep.subr.bf16.mxu1 %v1976_v0 }
 0x1dd   : > { %1600 = vmatpush3.bf16.xpose.msra.mxu1 %v2273_v54 }
 0x1de   : > { %1601 = vmatprep.subr.bf16.mxu1 %v1976_v0 }
 0x1e5   : > { %1602 = vmatpush3.bf16.xpose.msra.mxu1 %v2278_v56 }
 0x1e6   : > { %1603 = vmatprep.subr.bf16.mxu1 %v1976_v0 }
 0x1ed   : > { %1604 = vmatpush3.bf16.xpose.msra.mxu1 %v2283_v58 }
 0x1ee   : > { %1605 = vmatprep.subr.bf16.mxu1 %v1976_v0 }
 0x1f5   : > { %1606 = vmatpush3.bf16.xpose.msra.mxu1 %v2288_v60 }
 0x1f6   : > { %1607 = vmatprep.subr.bf16.mxu1 %v1976_v0 }
 0x1fd   : > { %1608 = vmatpush3.bf16.xpose.msra.mxu1 %v2293_v62 }
 0x1fe   : > { %1633 = vmatprep.subr.bf16.mxu1 %v1976_v0 }
 0x219   : > { %v807_v63 = vpop.f32.mrf.mxu1 }
 0x21a   : > { %v808_v4 = vadd.f32 %v1404_v1, %v807_v63 }
 0x21b   : > { %v1571_v2 = vpop.f32.mrf.mxu1 }
 0x21d   : > { %v810_v3 = vpop.f32.mrf.mxu1 }
 0x21e   : > { %v811_v5 = vadd.f32 %v1404_v1, %v810_v3 }
 0x21f   : > { %v1572_v6 = vpop.f32.mrf.mxu1 }
 0x220   : > { %v814_v7 = vpack.c.bf16 %v811_v5, %v808_v4 }
 0x222   : > { %910 = vrot.lane.b32.xlu0 %v814_v7, %s1978_s17  ;;  %1023 = vrot.lane.b32.xlu1 %v814_v7, %s1980_s18 }
 0x223   : > { %1590 = vmatmul.mubr.msk.bf16.vlgmr.msra.gmra.mxu0 %vm489_vm1, %v814_v7 }
 0x224   : > { %1614 = vmatpush3.bf16.xpose.msra.mxu0 %v2258_v48  ;;  %1629 = vmatprep.mubr.msk.bf16.mxu0 %vm1977_vm0, %v1976_v0 }
 0x225   : > { %1615 = vmatprep.subr.bf16.mxu0 %v1976_v0 }
 0x226   : > { %1088 = vrot.lane.b32.xlu0 %v814_v7, %s1981_s21  ;;  %1153 = vrot.lane.b32.xlu1 %v814_v7, %s1982_s24 }
 0x22a   : > { %901 = vperm.xlu0 %1755, %v808_v4   ;;  %906 = vperm.xlu1 %1756, %v811_v5  }
 0x22c   : > { %1616 = vmatpush3.bf16.xpose.msra.mxu0 %v2263_v50 }
 0x22d   : > { %1617 = vmatprep.subr.bf16.mxu0 %v1976_v0 }
 0x22e   : > { %1758 = vset.pattern.permute.xlu0 %v1983_v8  ;;  %1757 = vset.pattern.permute.xlu1 %v1983_v8 }
 0x22f   : > { %1020 = vperm.xlu0 %1758, %v811_v5   ;;  %1016 = vperm.xlu1 %1757, %v808_v4  }
 0x233   : > { %1760 = vset.pattern.permute.xlu0 %v1984_v9  ;;  %1759 = vset.pattern.permute.xlu1 %v1985_v10 }
 0x234   : > { %1618 = vmatpush3.bf16.xpose.msra.mxu0 %v2268_v52  ;;  %1146 = vperm.xlu0 %1760, %v808_v4  }
 0x235   : > { %1081 = vperm.xlu1 %1759, %v808_v4   ;;  %1619 = vmatprep.subr.bf16.mxu0 %v1976_v0 }
 0x239   : > { %1085 = vperm.xlu1 %1759, %v811_v5  }
 0x23c   : > { %1620 = vmatpush3.bf16.xpose.msra.mxu0 %v2273_v54 }
 0x23d   : > { %1761 = vset.pattern.permute.xlu1 %v1984_v9  ;;  %1621 = vmatprep.subr.bf16.mxu0 %v1976_v0 }
 0x23e   : > { %1150 = vperm.xlu1 %1761, %v811_v5  }
 0x244   : > { %1622 = vmatpush3.bf16.xpose.msra.mxu0 %v2278_v56 }
 0x245   : > { %1623 = vmatprep.subr.bf16.mxu0 %v1976_v0 }
 0x24c   : > { %1624 = vmatpush3.bf16.xpose.msra.mxu0 %v2283_v58 }
 0x24d   : > { %1625 = vmatprep.subr.bf16.mxu0 %v1976_v0 }
 0x254   : > { %1626 = vmatpush3.bf16.xpose.msra.mxu0 %v2288_v60 }
 0x255   : > { %1627 = vmatprep.subr.bf16.mxu0 %v1976_v0 }
 0x25c   : > { %1628 = vmatpush3.bf16.xpose.msra.mxu0 %v2293_v62 }
 0x25d   : > { %1653 = vmatprep.subr.bf16.mxu0 %v1976_v0 }
 0x294   : > { %v911_v11 = vpop.permute.xlu0 %910  ;;  %v1024_v12 = vpop.permute.xlu1 %1023 }
 0x295   : > { %1610 = vmatmul.mubr.msk.bf16.vlgmr.msra.gmra.mxu1 %vm936_vm7, %v911_v11  ;;  %1630 = vmatmul.mubr.msk.bf16.vlgmr.msra.gmra.mxu0 %vm936_vm7, %v1024_v12 }
 0x296   : > { %1634 = vmatpush3.bf16.xpose.msra.mxu1 %v2258_v48  ;;  %1654 = vmatpush3.bf16.xpose.msra.mxu0 %v2258_v48 }
 0x297   : > { %1635 = vmatprep.subr.bf16.mxu1 %v1976_v0  ;;  %1655 = vmatprep.subr.bf16.mxu0 %v1976_v0 }
 0x298   : > { %1649 = vmatprep.mubr.msk.bf16.mxu1 %vm1977_vm0, %v1976_v0  ;;  %1669 = vmatprep.mubr.msk.bf16.mxu0 %vm1977_vm0, %v1976_v0  ;;  %v1089_v13 = vpop.permute.xlu0 %1088  ;;  %v1154_v14 = vpop.permute.xlu1 %1153  ;;  %vm884_vm0 = vcmp.lt.s32.totalorder %v408_v17, %v883_v19 }
 0x29e   : > { %1636 = vmatpush3.bf16.xpose.msra.mxu1 %v2263_v50  ;;  %1656 = vmatpush3.bf16.xpose.msra.mxu0 %v2263_v50 }
 0x29f   : > { %1637 = vmatprep.subr.bf16.mxu1 %v1976_v0  ;;  %1657 = vmatprep.subr.bf16.mxu0 %v1976_v0 }
 0x2a5   : > { %v902_v16 = vpop.permute.xlu0 %901  ;;  %v907_v24 = vpop.permute.xlu1 %906 }
 0x2a6   : > { %1638 = vmatpush3.bf16.xpose.msra.mxu1 %v2268_v52  ;;  %1658 = vmatpush3.bf16.xpose.msra.mxu0 %v2268_v52 }
 0x2a7   : > { %1639 = vmatprep.subr.bf16.mxu1 %v1976_v0  ;;  %1659 = vmatprep.subr.bf16.mxu0 %v1976_v0 }
 0x2aa   : > { %v1021_v30 = vpop.permute.xlu0 %1020  ;;  %v1017_v31 = vpop.permute.xlu1 %1016 }
 0x2ae   : > { %1640 = vmatpush3.bf16.xpose.msra.mxu1 %v2273_v54  ;;  %1660 = vmatpush3.bf16.xpose.msra.mxu0 %v2273_v54 }
 0x2af   : > { %1641 = vmatprep.subr.bf16.mxu1 %v1976_v0  ;;  %1661 = vmatprep.subr.bf16.mxu0 %v1976_v0  ;;  %v1147_v48 = vpop.permute.xlu0 %1146 }
 0x2b0   : > { %v1082_v42 = vpop.permute.xlu1 %1081 }
 0x2b4   : > { %v1086_v43 = vpop.permute.xlu1 %1085 }
 0x2b6   : > { %1642 = vmatpush3.bf16.xpose.msra.mxu1 %v2278_v56  ;;  %1662 = vmatpush3.bf16.xpose.msra.mxu0 %v2278_v56 }
 0x2b7   : > { %1643 = vmatprep.subr.bf16.mxu1 %v1976_v0  ;;  %1663 = vmatprep.subr.bf16.mxu0 %v1976_v0 }
 0x2b9   : > { %v1151_v49 = vpop.permute.xlu1 %1150 }
 0x2be   : > { %1644 = vmatpush3.bf16.xpose.msra.mxu1 %v2283_v58  ;;  %1664 = vmatpush3.bf16.xpose.msra.mxu0 %v2283_v58 }
 0x2bf   : > { %1645 = vmatprep.subr.bf16.mxu1 %v1976_v0  ;;  %1665 = vmatprep.subr.bf16.mxu0 %v1976_v0 }
 0x2c6   : > { %1646 = vmatpush3.bf16.xpose.msra.mxu1 %v2288_v60  ;;  %1666 = vmatpush3.bf16.xpose.msra.mxu0 %v2288_v60 }
 0x2c7   : > { %1647 = vmatprep.subr.bf16.mxu1 %v1976_v0  ;;  %1667 = vmatprep.subr.bf16.mxu0 %v1976_v0 }
 0x2ce   : > { %1648 = vmatpush3.bf16.xpose.msra.mxu1 %v2293_v62  ;;  %1668 = vmatpush3.bf16.xpose.msra.mxu0 %v2293_v62 }
 0x2d5   : > { %1650 = vmatmul.mubr.msk.bf16.vlgmr.msra.gmra.mxu1 %vm936_vm7, %v1089_v13  ;;  %1670 = vmatmul.mubr.msk.bf16.vlgmr.msra.gmra.mxu0 %vm936_vm7, %v1154_v14 }
 0x2e3   : > { %v876_v20 = vpop.f32.mrf.mxu0 }
 0x2e4   : > { %v887_v18 = vsel %vm884_vm0, %v876_v20, -100000.0 }
 0x2e5   : > { %v1591_v21 = vpop.f32.mrf.mxu0 }
 0x2e7   : > { %v879_v0 = vpop.f32.mrf.mxu0 }
 0x2e8   : > { %v888_v22 = vsel %vm884_vm0, %v879_v0, -100000.0 }
 0x2e9   : > { %v1448_v23 = vpack.c.bf16 %v888_v22, %v887_v18  ;;  %v1592_v25 = vpop.f32.mrf.mxu0 }
 0x2eb   : > { %1449 = vst [vmem:[%s400_s28] sm:$0xff] %v1448_v23  }
 0x355   : > { %v998_v26 = vpop.f32.mrf.mxu1  ;;  %v1062_v27 = vpop.f32.mrf.mxu0 }
 0x356   : > { %v999_v34 = vadd.f32 %v998_v26, %v902_v16  ;;  %v1063_v35 = vadd.f32 %v1062_v27, %v1017_v31 }
 0x357   : > { %v1611_v28 = vpop.f32.mrf.mxu1  ;;  %v1631_v29 = vpop.f32.mrf.mxu0 }
 0x359   : > { %v1001_v32 = vpop.f32.mrf.mxu1  ;;  %v1065_v33 = vpop.f32.mrf.mxu0 }
 0x35a   : > { %v1002_v36 = vadd.f32 %v1001_v32, %v907_v24  ;;  %v1066_v37 = vadd.f32 %v1065_v33, %v1021_v30 }
 0x35b   : > { %v1612_v38 = vpop.f32.mrf.mxu1  ;;  %v1632_v39 = vpop.f32.mrf.mxu0 }
 0x35c   : > { %v1453_v40 = vpack.c.bf16 %v1002_v36, %v999_v34  ;;  %v1458_v41 = vpack.c.bf16 %v1066_v37, %v1063_v35 }
 0x35e   : > { %1454 = vst [vmem:[%s405_s30] sm:$0xff] %v1453_v40   ;;  %1470 = vst [vmem:[%s405_s30 + $0x8] sm:$0xff] %v1458_v41  }
 0x395   : > { %v1127_v44 = vpop.f32.mrf.mxu1  ;;  %v1192_v45 = vpop.f32.mrf.mxu0 }
 0x396   : > { %v1128_v52 = vadd.f32 %v1127_v44, %v1082_v42  ;;  %v1193_v53 = vadd.f32 %v1192_v45, %v1147_v48 }
 0x397   : > { %v1651_v46 = vpop.f32.mrf.mxu1  ;;  %v1671_v47 = vpop.f32.mrf.mxu0 }
 0x399   : > { %v1130_v50 = vpop.f32.mrf.mxu1  ;;  %v1195_v51 = vpop.f32.mrf.mxu0 }
 0x39a   : > { %v1131_v54 = vadd.f32 %v1130_v50, %v1086_v43  ;;  %v1196_v55 = vadd.f32 %v1195_v51, %v1151_v49 }
 0x39b   : > { %v1652_v56 = vpop.f32.mrf.mxu1  ;;  %v1672_v57 = vpop.f32.mrf.mxu0 }
 0x39c   : > { %v1463_v58 = vpack.c.bf16 %v1131_v54, %v1128_v52  ;;  %v1468_v59 = vpack.c.bf16 %v1196_v55, %v1193_v53 }
 0x39e   : > { %1471 = vst [vmem:[%s405_s30 + $0x10] sm:$0xff] %v1463_v58   ;;  %1472 = vst [vmem:[%s405_s30 + $0x18] sm:$0xff] %v1468_v59  }
 0x39f PF: > { %s28_s12 = sadd.s32 1, %s1965_s12  }
 0x3a0   : > { %p25_p2 = scmp.ge.s32.totalorder %s28_s12, 4  }
 0x3a2   :  { %27 = sbr.rel (!%p25_p2) target bundleno = 9 (0x9), region = 118 }
 0x3a7   :  { %1247 = vsyncpa [#allocation5], 1 }
 0x3a8   :  { %1249 = vsyncpa [#allocation5 + $0x1], 1 }
 0x3a9   :  { %1250 = vsyncpa [#allocation7], 1 }
 0x3aa   :  { %1251 = vsyncpa [#allocation10], 1 }
 0x3ab   :  { %1252 = vsyncpa [#allocation13], 1 }

</bundles_post_ra>
